<compile_context>
chip_gen: v7x
topology: tpu7x:2x2x1
jax: 0.10.0
libtpu: 0.0.40
codegen_flags: <defaults>
</compile_context>

<pallas_src>
import jax
import jax.numpy as jnp
from jax.experimental import pallas as pl
from jax.experimental.pallas import tpu as pltpu


_VMEM_BUDGET = 32 << 20      # target tile footprint: fits every generation (v7x has 64 MiB phys)
_VMEM_HEADROOM = 8 << 20


def _round_up(x, m):
    return ((x + m - 1) // m) * m


def _cdiv(a, b):
    return -(-a // b)


def _pick_tile(extent, align, cap):
    """Tile size (multiple of `align`, <= cap) minimizing padded extent,
    preferring the largest such tile (fewest grid steps)."""
    extent = max(int(extent), 1)
    cap = max(align, (int(cap) // align) * align)
    ext_aligned = _round_up(extent, align)
    if ext_aligned <= cap:
        return ext_aligned                       # one tile, zero extra padding
    best_t, best_pad = None, None
    n0 = _cdiv(extent, cap)
    for n in range(n0, n0 + 8):                  # a few tile-count candidates
        t = min(cap, _round_up(_cdiv(extent, n), align))
        padded = _round_up(extent, t)
        if best_pad is None or padded < best_pad or (padded == best_pad and t > best_t):
            best_t, best_pad = t, padded
    return best_t


def _linear_kernel(x_ref, w_ref, b_ref, o_ref, acc_ref):
    # Grid axes: (i over batch tiles, j over output tiles, k over reduction).
    k = pl.program_id(2)
    nk = pl.num_programs(2)

    # bf16 x bf16 -> f32 on the MXU.
    prod = jnp.dot(x_ref[...], w_ref[...], preferred_element_type=jnp.float32)

    @pl.when(k == 0)
    def _():
        acc_ref[...] = prod                      # direct write: skip zero-init pass

    @pl.when(k > 0)
    def _():
        acc_ref[...] = acc_ref[...] + prod

    # Finalize once per (i, j): add bias, cast, lane-dense store.
    @pl.when(k == nk - 1)
    def _():
        o_ref[...] = (acc_ref[...] + b_ref[...]).astype(o_ref.dtype)


class LinearPredictorPallas:
    """Deterministic Linear predictor (y = x @ W + b) backed by the Pallas matmul.

    w: [H, O] (already transposed vs. torch's [O, H]);  b: [1, O] or [O].
    The weight cast + pad happens once here, not on every forward call.
    """

    def __init__(self, w, b, *, batch_hint=None, out_dtype=None):
        H, O = w.shape
        self.H, self.O = H, O
        self.out_dtype = out_dtype

        # --- tile selection (done once) -----------------------------------
        # tm assumption is only used to size tn/tk; the actual tm is per-call.
        tm_hint = _pick_tile(batch_hint if batch_hint is not None else 512, 16, 512)
        # Skinny batches -> spend the VMEM headroom on wider output tiles.
        if tm_hint <= 64:
            tn_cap = 2048
        elif tm_hint <= 256:
            tn_cap = 1024
        else:
            tn_cap = 512
        tn = _pick_tile(O, 128, tn_cap)

        # Keep >=2 output tiles when the grid would otherwise collapse to a
        # single parallel step, so v7x's two TensorCores both get work.
        # Only when halving keeps 128-alignment and adds no padding.
        if (batch_hint is not None
                and _round_up(max(batch_hint, 1), 16) <= tm_hint
                and _round_up(O, tn) == tn
                and tn >= 256 and tn % 256 == 0):
            tn //= 2

        # tk: fill the remaining per-tile VMEM budget (amortizes the f32
        # accumulator RMW and per-step DMA overhead).  Per tk element:
        # x double-buffer costs 4*tm bytes, W double-buffer costs 4*tn bytes.
        fixed = 2 * tm_hint * tn * 4 + tm_hint * tn * 4 + 2 * tn * 4
        per_tk = 4 * (tm_hint + tn)
        tk_cap = min(2048, max(128, (_VMEM_BUDGET - fixed) // per_tk))
        tk = _pick_tile(H, 128, tk_cap)

        self.tn, self.tk = tn, tk
        self.Hp = _round_up(H, tk)
        self.Op = _round_up(O, tn)

        # --- hoisted parameter prep (once, not per call) -------------------
        w16 = jnp.asarray(w).astype(jnp.bfloat16)
        b32 = jnp.asarray(b).astype(jnp.float32).reshape(1, O)
        self.wp = jnp.pad(w16, ((0, self.Hp - H), (0, self.Op - O)))
        self.bp = jnp.pad(b32, ((0, 0), (0, self.Op - O)))

    def __call__(self, x):
        B, H = x.shape
        assert H == self.H, "input hidden dim must match weight contraction dim"
        out_dtype = self.out_dtype if self.out_dtype is not None else x.dtype
        out_bytes = jnp.dtype(out_dtype).itemsize
        tn, tk, Hp, Op = self.tn, self.tk, self.Hp, self.Op

        # Per-call row tile: minimize padding, respect the VMEM budget given
        # the fixed tn/tk chosen at construction.
        w_fixed = 2 * tk * tn * 2 + 2 * tn * 4                    # W double-buffer + bias
        per_tm = 4 * tk + 2 * tn * out_bytes + 4 * tn             # x dbl-buf + out dbl-buf + acc
        tm_cap = max(16, min(512, ((_VMEM_BUDGET - w_fixed) // per_tm // 16) * 16))
        tm = _pick_tile(B, 16, tm_cap)
        Bp = _round_up(B, tm)

        xp = jnp.pad(x.astype(jnp.bfloat16), ((0, Bp - B), (0, Hp - H)))

        grid = (Bp // tm, Op // tn, Hp // tk)                     # reduction axis last

        footprint = (2 * tm * tk * 2 + 2 * tk * tn * 2
                     + 2 * tm * tn * out_bytes + tm * tn * 4 + 2 * tn * 4)
        vmem_limit = int(min(footprint + _VMEM_HEADROOM, 48 << 20))   # <= ~48 MiB: v7x-safe

        out_p = pl.pallas_call(
            _linear_kernel,
            out_shape=jax.ShapeDtypeStruct((Bp, Op), out_dtype),
            grid=grid,
            in_specs=[
                pl.BlockSpec((tm, tk), lambda i, j, k: (i, k)),   # x tile
                pl.BlockSpec((tk, tn), lambda i, j, k: (k, j)),   # W tile
                pl.BlockSpec((1, tn), lambda i, j, k: (0, j)),    # bias (const over i, k)
            ],
            out_specs=pl.BlockSpec((tm, tn), lambda i, j, k: (i, j)),
            scratch_shapes=[pltpu.VMEM((tm, tn), jnp.float32)],
            compiler_params=pltpu.CompilerParams(
                dimension_semantics=("parallel", "parallel", "arbitrary"),
                vmem_limit_bytes=vmem_limit,
            ),
            cost_estimate=pl.CostEstimate(
                flops=2 * Bp * Hp * Op,
                transcendentals=0,
                bytes_accessed=(
                    Bp * Hp * 2 * grid[1]        # x re-streamed per output-column tile
                    + Hp * Op * 2 * grid[0]      # W re-streamed per batch tile
                    + Op * 4 * grid[0]           # bias per batch tile
                    + Bp * Op * out_bytes        # output writeback
                ),
            ),
        )(xp, self.wp, self.bp)

        # Slice the lane/sublane padding back off.
        return out_p[:B, :self.O]


class MetaBrainOutputPallas:
    """Mirror of the PyTorch wrapper: holds a name and delegates to the predictor."""

    def __init__(self, name, predictor):
        self.name = name
        self.predictor = predictor

    def __call__(self, x):
        return self.predictor(x)


if __name__ == "__main__":
    # Small shapes: batch=8, hidden=32, out=16 (predictor = Linear(32, 16)).
    # NOTE: at these toy shapes the Pallas call is pure launch overhead; the
    # tiling logic pays off at real (hundreds-to-thousands) extents.
    B, H, O = 8, 32, 16
    key = jax.random.PRNGKey(0)
    kx, kw, kb = jax.random.split(key, 3)

    x = jax.random.normal(kx, (B, H), dtype=jnp.float32)
    # Deterministic "parameter init" (synthetic, not a checkpoint load).
    w = jax.random.normal(kw, (H, O), dtype=jnp.float32) * 0.05
    b = jax.random.normal(kb, (1, O), dtype=jnp.float32) * 0.01

    predictor = LinearPredictorPallas(w, b, batch_hint=B)   # weights prepped once here
    module = MetaBrainOutputPallas(name="meta_brain_out", predictor=predictor)

    out = module(x)
    jax.block_until_ready(out)

    # Reference uses the same bf16-rounded inputs the kernel feeds the MXU,
    # with f32 accumulation — matches the kernel's effective arithmetic.
    xr = x.astype(jnp.bfloat16).astype(jnp.float32)
    wr = w.astype(jnp.bfloat16).astype(jnp.float32)
    ref = xr @ wr + b

    assert out.shape == (B, O)
    assert jnp.allclose(out, ref, atol=2e-2, rtol=2e-2)

    print("KERNEL_OK")
</pallas_src>

<mosaic_0001>
module attributes {stable_mosaic.version = 11 : i64} {
  func.func @_linear_kernel(%arg0: i32, %arg1: i32, %arg2: i32, %arg3: memref<16x128xbf16, #tpu.memory_space<vmem>>, %arg4: memref<128x128xbf16, #tpu.memory_space<vmem>>, %arg5: memref<1x128xf32, #tpu.memory_space<vmem>>, %arg6: memref<16x128xf32, #tpu.memory_space<vmem>>, %arg7: memref<16x128xf32, #tpu.memory_space<vmem>>) attributes {dimension_semantics = [#tpu.dimension_semantics<parallel>, #tpu.dimension_semantics<parallel>, #tpu.dimension_semantics<arbitrary>], iteration_bounds = array<i64: 1, 1, 1>, scalar_prefetch = 0 : i64, scratch_operands = 1 : i64, tpu.core_type = #tpu.core_type<tc>, window_params = [{transform_indices = @transform_0, window_bounds = array<i64: 16, 128>}, {transform_indices = @transform_1, window_bounds = array<i64: 128, 128>}, {transform_indices = @transform_2, window_bounds = array<i64: 1, 128>}, {transform_indices = @transform_3, window_bounds = array<i64: 16, 128>}]} {
    %c0 = arith.constant 0 : index
    %c0_0 = arith.constant 0 : index
    %0 = vector.load %arg3[%c0, %c0_0] : memref<16x128xbf16, #tpu.memory_space<vmem>>, vector<16x128xbf16>
    %c0_1 = arith.constant 0 : index
    %c0_2 = arith.constant 0 : index
    %1 = vector.load %arg4[%c0_1, %c0_2] : memref<128x128xbf16, #tpu.memory_space<vmem>>, vector<128x128xbf16>
    %cst = arith.constant dense<0.000000e+00> : vector<16x128xf32>
    %2 = tpu.matmul %0, %1, %cst {dimension_numbers = #tpu.dot_dimension_numbers<[1], [0], [0], [1], [0, 0, 1, 1], [], []>} : vector<16x128xbf16>, vector<128x128xbf16>, vector<16x128xf32> -> vector<16x128xf32>
    %c0_i32 = arith.constant 0 : i32
    %3 = arith.cmpi eq, %arg2, %c0_i32 : i32
    %4 = arith.extui %3 : i1 to i32
    %c0_i32_3 = arith.constant 0 : i32
    %5 = arith.cmpi ne, %4, %c0_i32_3 : i32
    scf.if %5 {
      %c0_8 = arith.constant 0 : index
      %c0_9 = arith.constant 0 : index
      %12 = vector.load %arg7[%c0_8, %c0_9] : memref<16x128xf32, #tpu.memory_space<vmem>>, vector<16x128xf32>
      tpu.vector_store %arg7[%c0_8, %c0_9], %2 {strides = array<i32>} : memref<16x128xf32, #tpu.memory_space<vmem>>, vector<16x128xf32>,
    } else {
    }
    %c0_i32_4 = arith.constant 0 : i32
    %6 = arith.cmpi sgt, %arg2, %c0_i32_4 : i32
    %7 = arith.extui %6 : i1 to i32
    %c0_i32_5 = arith.constant 0 : i32
    %8 = arith.cmpi ne, %7, %c0_i32_5 : i32
    scf.if %8 {
      %c0_8 = arith.constant 0 : index
      %c0_9 = arith.constant 0 : index
      %12 = vector.load %arg7[%c0_8, %c0_9] : memref<16x128xf32, #tpu.memory_space<vmem>>, vector<16x128xf32>
      %13 = arith.addf %12, %2 : vector<16x128xf32>
      %c0_10 = arith.constant 0 : index
      %c0_11 = arith.constant 0 : index
      %14 = vector.load %arg7[%c0_10, %c0_11] : memref<16x128xf32, #tpu.memory_space<vmem>>, vector<16x128xf32>
      tpu.vector_store %arg7[%c0_10, %c0_11], %13 {strides = array<i32>} : memref<16x128xf32, #tpu.memory_space<vmem>>, vector<16x128xf32>,
    } else {
    }
    %c0_i32_6 = arith.constant 0 : i32
    %9 = arith.cmpi eq, %arg2, %c0_i32_6 : i32
    %10 = arith.extui %9 : i1 to i32
    %c0_i32_7 = arith.constant 0 : i32
    %11 = arith.cmpi ne, %10, %c0_i32_7 : i32
    scf.if %11 {
      %c0_8 = arith.constant 0 : index
      %c0_9 = arith.constant 0 : index
      %12 = vector.load %arg7[%c0_8, %c0_9] : memref<16x128xf32, #tpu.memory_space<vmem>>, vector<16x128xf32>
      %c0_10 = arith.constant 0 : index
      %c0_11 = arith.constant 0 : index
      %13 = vector.load %arg5[%c0_10, %c0_11] : memref<1x128xf32, #tpu.memory_space<vmem>>, vector<1x128xf32>
      %14 = vector.broadcast %13 : vector<1x128xf32> to vector<16x128xf32>
      %15 = arith.addf %12, %14 : vector<16x128xf32>
      %c0_12 = arith.constant 0 : index
      %c0_13 = arith.constant 0 : index
      %16 = vector.load %arg6[%c0_12, %c0_13] : memref<16x128xf32, #tpu.memory_space<vmem>>, vector<16x128xf32>
      tpu.vector_store %arg6[%c0_12, %c0_13], %15 {strides = array<i32>} : memref<16x128xf32, #tpu.memory_space<vmem>>, vector<16x128xf32>,
    } else {
    }
    return
  }
  func.func @transform_0(%arg0: i32, %arg1: i32, %arg2: i32) -> (i32, i32) {
    %c0_i32 = arith.constant 0 : i32
    return %arg0, %arg2 : i32, i32
  }
  func.func @transform_1(%arg0: i32, %arg1: i32, %arg2: i32) -> (i32, i32) {
    %c0_i32 = arith.constant 0 : i32
    return %arg2, %arg1 : i32, i32
  }
  func.func @transform_2(%arg0: i32, %arg1: i32, %arg2: i32) -> (i32, i32) {
    %c0_i32 = arith.constant 0 : i32
    %c0_i32_0 = arith.constant 0 : i32
    return %c0_i32, %arg1 : i32, i32
  }
  func.func @transform_3(%arg0: i32, %arg1: i32, %arg2: i32) -> (i32, i32) {
    %c0_i32 = arith.constant 0 : i32
    return %arg0, %arg1 : i32, i32
  }
}

</mosaic_0001>

<bundles_post_ra>
// kernel: tpu_custom_call.1
= control target key start
LH: loop header
LB: loop body
LE: loop exit
PB: predicated region body
PF: predicated region fallthrough
CT: control target
= control target key end

     0   :  { %8 = vsyncpa [#allocation4], 0  ;;  %s404_s0 = inlined_call_operand.hbm [shape: bf16[16,128], index: 0, kind: input, shape index: {}]   ;;  %s405_s1 = inlined_call_operand.hbm [shape: bf16[128,128], index: 1, kind: input, shape index: {}]   ;;  %s406_s2 = inlined_call_operand.vmem [shape: f32[1,128], index: 2, kind: input, shape index: {}]   ;;  %s407_s3 = inlined_call_operand.hbm [shape: f32[16,128], index: 3, kind: output, shape index: {}]  }
   0x1   :  { %9 = vsyncpa [#allocation7], 0 }
   0x2   :  { %10 = vsyncpa [#allocation5], 0  ;;  %s336_s12 = smov [#allocation3]   ;;  %s264_s16 = scalar_lea.hbm %s404_s0, 128 }
   0x3   :  { %s16_s13 = sshll.u32 %s336_s12, 4  ;;  %p265_p0 = scmp.ne.s32.totalorder %s404_s0, %s264_s16  ;;  %s17_s13 = int_to_ptr.vmem [resolvable:$true] %s16_s13 }
   0x4   :  { %p268_p1 = scmp.lt.u32.totalorder %s264_s16, %s404_s0 }
   0x6   :  { %p270_p2 = pnand %p268_p1, %p265_p0 }
   0x8   :  { %273 = shalt.err (!%p270_p2)
}
   0x9   :  { %s274_s21 = scalar_lea.vmem %s17_s13, 128  ;;  %p279_p4 = scmp.lt.s32.totalorder %s17_s13, %s17_s13 }
   0xa   :  { %p275_p3 = scmp.ne.s32.totalorder %s17_s13, %s274_s21  ;;  %p280_p5 = scmp.lt.s32.totalorder %s274_s21, %s274_s21 }
   0xc   :  { %p281_p6 = por %p280_p5, %p279_p4 }
   0xe   :  { %p282_p7 = pnand %p281_p6, %p275_p3 }
  0x10   :  { %285 = shalt.err (!%p282_p7)
}
  0x11   :  { %s337_s22 = smov 64   ;;  %s338_s23 = smov 4  }
  0x12   :  { %22 = dma.hbm_to_vmem [thread:$0]  %s404_s0, 128, %s17_s13, [#allocation4], %s337_s22, %s337_s22, %s338_s23  }
  0x13   :  { %s339_s26 = smov [#allocation6]   ;;  %s286_s30 = scalar_lea.hbm %s405_s1, 1024 }
  0x14   :  { %s28_s27 = sshll.u32 %s339_s26, 4  ;;  %p287_p8 = scmp.ne.s32.totalorder %s405_s1, %s286_s30  ;;  %s29_s27 = int_to_ptr.vmem [resolvable:$true] %s28_s27 }
  0x15   :  { %p290_p9 = scmp.lt.u32.totalorder %s286_s30, %s405_s1 }
  0x17   :  { %p292_p10 = pnand %p290_p9, %p287_p8 }
  0x19   :  { %295 = shalt.err (!%p292_p10)
}
  0x1a   :  { %s296_s8 = scalar_lea.vmem %s29_s27, 1024  ;;  %p301_p12 = scmp.lt.s32.totalorder %s29_s27, %s29_s27 }
  0x1b   :  { %p297_p11 = scmp.ne.s32.totalorder %s29_s27, %s296_s8  ;;  %p302_p13 = scmp.lt.s32.totalorder %s296_s8, %s296_s8 }
  0x1d   :  { %p303_p0 = por %p302_p13, %p301_p12 }
  0x1f   :  { %p304_p1 = pnand %p303_p0, %p297_p11 }
  0x21   :  { %307 = shalt.err (!%p304_p1)
}
  0x22   :  { %34 = dma.hbm_to_vmem [thread:$0]  %s405_s1, 1024, %s29_s27, [#allocation7], %s337_s22, %s337_s22, %s338_s23  }
  0x23   :  { %330 = dma.done.wait [#allocation4], 128  }
  0x24   :  { %331 = vsyncadd [#allocation4], 4294967168 }
  0x25   :  { %332 = dma.done.wait [#allocation7], 1024  }
  0x26   :  { %333 = vsyncadd [#allocation7], 4294966272  ;;  %v340_v0 = vmov 0.0   ;;  %vm341_vm0 = vmmov 0   ;;  %v255_v1 = vld [vmem:[#allocation6] sm:$0xff]   ;;  %v256_v2 = vld [vmem:[#allocation6 + $0x8] sm:$0xff]  }
  0x27   :  { %226 = vmatprep.subr.bf16.mxu0 %v340_v0  ;;  %242 = vmatprep.mubr.msk.bf16.mxu0 %vm341_vm0, %v340_v0  ;;  %v257_v3 = vld [vmem:[#allocation6 + $0x10] sm:$0xff]   ;;  %v258_v4 = vld [vmem:[#allocation6 + $0x18] sm:$0xff]   ;;  %v259_v5 = vld [vmem:[#allocation6 + $0x20] sm:$0xff]   ;;  %s342_s11 = smov [#allocation8]  }
  0x28   :  { %227 = vmatpush3.bf16.msra.mxu0 %v255_v1  ;;  %v260_v6 = vld [vmem:[#allocation6 + $0x28] sm:$0xff]   ;;  %v261_v7 = vld [vmem:[#allocation6 + $0x30] sm:$0xff]   ;;  %v262_v8 = vld [vmem:[#allocation6 + $0x38] sm:$0xff]   ;;  %s194_s12 = sshll.u32 %s342_s11, 4  ;;  %s195_s12 = int_to_ptr.vmem [resolvable:$true] %s194_s12 }
  0x29   :  { %228 = vmatprep.subr.bf16.mxu0 %v340_v0  ;;  %v263_v9 = vld [vmem:[#allocation3] sm:$0xff]   ;;  %s308_s13 = scalar_lea.vmem %s195_s12, 256  ;;  %p313_p3 = scmp.lt.s32.totalorder %s195_s12, %s195_s12 }
  0x2a   :  { %v216_v10 = vld [vmem:[%s406_s2] ss:$0 sm:$0xff]  ;;  %p309_p2 = scmp.ne.s32.totalorder %s195_s12, %s308_s13  ;;  %p314_p4 = scmp.lt.s32.totalorder %s308_s13, %s308_s13 }
  0x2c   :  { %229 = vmatpush3.bf16.msra.mxu0 %v256_v2  ;;  %p315_p5 = por %p314_p4, %p313_p3 }
  0x2d   :  { %230 = vmatprep.subr.bf16.mxu0 %v340_v0 }
  0x2e   :  { %p316_p6 = pnand %p315_p5, %p309_p2 }
  0x30   :  { %231 = vmatpush3.bf16.msra.mxu0 %v257_v3 }
  0x31   :  { %232 = vmatprep.subr.bf16.mxu0 %v340_v0 }
  0x34   :  { %233 = vmatpush3.bf16.msra.mxu0 %v258_v4 }
  0x35   :  { %234 = vmatprep.subr.bf16.mxu0 %v340_v0 }
  0x38   :  { %235 = vmatpush3.bf16.msra.mxu0 %v259_v5 }
  0x39   :  { %236 = vmatprep.subr.bf16.mxu0 %v340_v0 }
  0x3c   :  { %237 = vmatpush3.bf16.msra.mxu0 %v260_v6 }
  0x3d   :  { %238 = vmatprep.subr.bf16.mxu0 %v340_v0 }
  0x40   :  { %239 = vmatpush3.bf16.msra.mxu0 %v261_v7 }
  0x41   :  { %240 = vmatprep.subr.bf16.mxu0 %v340_v0 }
  0x44   :  { %241 = vmatpush3.bf16.msra.mxu0 %v262_v8 }
  0x47   :  { %243 = vmatmul.mubr.bf16.vlgmr.msra.gmra.mrb[0].mxu0 %v263_v9 }
 0x11a   :  { %v150_v11 = vpop.f32.mrb[0].mxu0 }
 0x11b   :  { %v185_v12 = vadd.f32 %v216_v10, %v150_v11  ;;  %v244_v13 = vpop.f32.mrb[1].mxu0 }
 0x11c   :  { %v153_v14 = vpop.f32.mrb[2].mxu0 }
 0x11d   :  { %187 = vst [vmem:[#allocation8] sm:$0xff] %v185_v12  ;;  %v186_v15 = vadd.f32 %v216_v10, %v153_v14  ;;  %v245_v16 = vpop.f32.mrb[3].mxu0 }
 0x11f   :  { %188 = vst [vmem:[#allocation8 + $0x8] sm:$0xff] %v186_v15 }
 0x120   :  { %319 = shalt.err (!%p316_p6)
}
 0x121   :  { %s320_s15 = scalar_lea.hbm %s407_s3, 256 }
 0x122   :  { %p321_p7 = scmp.ne.s32.totalorder %s407_s3, %s320_s15  ;;  %p324_p8 = scmp.lt.u32.totalorder %s320_s15, %s407_s3 }
 0x124   :  { %p326_p9 = pnand %p324_p8, %p321_p7 }
 0x126   :  { %329 = shalt.err (!%p326_p9)
}
 0x127   :  { %s343_s20 = smov 128   ;;  %s344_s21 = smov 8  }
 0x128   :  { %200 = dma.vmem_to_hbm [thread:$0]  %s195_s12, 256, %s407_s3, [#allocation5], %s343_s20, %s343_s20, %s344_s21  }
 0x129   :  { %334 = dma.done.wait [#allocation5], 256  }
 0x12a   :  { %335 = vsyncadd [#allocation5], 4294967040 }
 0x12b   :  { %204 = vsyncpa [#allocation4], 1 }
 0x12c   :  { %205 = vsyncpa [#allocation7], 1 }
 0x12d   :  { %206 = vsyncpa [#allocation5], 1 }

</bundles_post_ra>
